<compile_context>
chip_gen: v7x
topology: tpu7x:2x2x1
jax: 0.10.0
libtpu: 0.0.40
codegen_flags: <defaults>
</compile_context>

<pallas_src>
import functools

import jax
import jax.numpy as jnp
from jax import lax
from jax.experimental import pallas as pl
from jax.experimental.pallas import tpu as pltpu


# ----------------------------------------------------------------------------
# small helpers
# ----------------------------------------------------------------------------

def _round_up(x, m):
    return (x + m - 1) // m * m


def _pick_tile(dim, cap, align):
    """Choose (tile, padded_dim) for one dimension.

    dim <= cap -> one full-dim block (any size is legal as a full-dim block).
    dim  > cap -> largest multiple-of-`align` tile <= cap dividing dim,
                  else fall back to `cap` with zero padding.
    """
    if dim <= cap:
        return dim, dim
    t = cap
    while t >= align:
        if dim % t == 0:
            return t, dim
        t -= align
    return cap, _round_up(dim, cap)


def _pad2(a, rows, cols):
    r, c = a.shape
    if r == rows and c == cols:
        return a
    return jnp.pad(a, ((0, rows - r), (0, cols - c)))


@functools.lru_cache(maxsize=None)
def _vmem_limit_bytes():
    # Generation-aware VMEM budget with headroom:
    #   v7x (64 MiB/TC) -> 48 MiB;  v5e/v6e (128 MiB) -> 96 MiB.
    try:
        cap = pltpu.get_tpu_info().vmem_capacity_bytes
    except Exception:
        cap = 64 * 1024 * 1024
    return int(max(32 * 1024 * 1024, min(96 * 1024 * 1024, cap * 3 // 4)))


def _cparams(*sems):
    return pltpu.CompilerParams(
        dimension_semantics=sems,
        vmem_limit_bytes=_vmem_limit_bytes())


# ----------------------------------------------------------------------------
# Pallas kernels
# ----------------------------------------------------------------------------

def _matmul_kernel(x_ref, w_ref, b_ref, o_ref, acc_ref):
    # grid = (M tiles, N tiles, K tiles); K innermost ("arbitrary").
    # w_ref is bf16 (cast once at param-prep time); x is cast to bf16 at the dot.
    @pl.when(pl.program_id(2) == 0)
    def _():
        acc_ref[...] = jnp.zeros(acc_ref.shape, jnp.float32)

    acc_ref[...] += jnp.dot(x_ref[...].astype(jnp.bfloat16), w_ref[...],
                            preferred_element_type=jnp.float32)

    @pl.when(pl.program_id(2) == pl.num_programs(2) - 1)
    def _():
        o_ref[...] = (acc_ref[...] + b_ref[...].astype(jnp.float32)
                      ).astype(o_ref.dtype)


def _matmul_residual_kernel(x_ref, w_ref, b_ref, r_ref, o_ref, acc_ref):
    # same as above, fused residual add at finalize (residual block is resident
    # across the K axis: its block index does not depend on k).
    @pl.when(pl.program_id(2) == 0)
    def _():
        acc_ref[...] = jnp.zeros(acc_ref.shape, jnp.float32)

    acc_ref[...] += jnp.dot(x_ref[...].astype(jnp.bfloat16), w_ref[...],
                            preferred_element_type=jnp.float32)

    @pl.when(pl.program_id(2) == pl.num_programs(2) - 1)
    def _():
        o_ref[...] = (acc_ref[...] + b_ref[...].astype(jnp.float32)
                      + r_ref[...].astype(jnp.float32)).astype(o_ref.dtype)


def _ln_matmul_kernel(x_ref, g_ref, bln_ref, w_ref, b_ref, o_ref, xn_ref, *, eps):
    # Fused LayerNorm(row) -> xn @ W + b.  x block carries the full feature dim
    # (exact LN statistics).  grid = (M tiles, N tiles), N innermost.
    # LN is computed once per M tile (j == 0) into a bf16 VMEM scratch and reused
    # for every N tile.
    @pl.when(pl.program_id(1) == 0)
    def _():
        x = x_ref[...].astype(jnp.float32)
        mean = jnp.mean(x, axis=-1, keepdims=True)
        var = jnp.mean(jnp.square(x - mean), axis=-1, keepdims=True)
        xn = (x - mean) * lax.rsqrt(var + eps)
        xn = xn * g_ref[...].astype(jnp.float32) + bln_ref[...].astype(jnp.float32)
        xn_ref[...] = xn.astype(xn_ref.dtype)

    acc = jnp.dot(xn_ref[...], w_ref[...], preferred_element_type=jnp.float32)
    o_ref[...] = (acc + b_ref[...].astype(jnp.float32)).astype(o_ref.dtype)


def _ln_geglu_kernel(x_ref, g_ref, bln_ref, wa_ref, ba_ref, wg_ref, bg_ref,
                     o_ref, xn_ref, *, eps):
    # Fused LayerNorm -> GeGLU:  (xn @ Wa + ba) * gelu(xn @ Wg + bg)  (exact erf).
    # LN stashed in bf16 scratch once per M tile and reused across N tiles.
    @pl.when(pl.program_id(1) == 0)
    def _():
        x = x_ref[...].astype(jnp.float32)
        mean = jnp.mean(x, axis=-1, keepdims=True)
        var = jnp.mean(jnp.square(x - mean), axis=-1, keepdims=True)
        xn = (x - mean) * lax.rsqrt(var + eps)
        xn = xn * g_ref[...].astype(jnp.float32) + bln_ref[...].astype(jnp.float32)
        xn_ref[...] = xn.astype(xn_ref.dtype)

    xn = xn_ref[...]
    a = jnp.dot(xn, wa_ref[...],
                preferred_element_type=jnp.float32) + ba_ref[...].astype(jnp.float32)
    g = jnp.dot(xn, wg_ref[...],
                preferred_element_type=jnp.float32) + bg_ref[...].astype(jnp.float32)
    gelu_g = 0.5 * g * (1.0 + lax.erf(g * 0.7071067811865476))
    o_ref[...] = (a * gelu_g).astype(o_ref.dtype)


def _scale_shift_matmul_kernel(x_ref, s_ref, t_ref, w_ref, b_ref, o_ref, xn_ref):
    # Fused GroupNorm-affine apply + 1x1-conv (proj_in) in token layout.
    # grid = (B, M tiles over HW, N tiles); scale/shift are per-(batch, channel).
    # The normalized tile is computed once per (b, i) into bf16 scratch.
    @pl.when(pl.program_id(2) == 0)
    def _():
        x = x_ref[0].astype(jnp.float32)
        xn = x * s_ref[0].astype(jnp.float32) + t_ref[0].astype(jnp.float32)
        xn_ref[...] = xn.astype(xn_ref.dtype)

    acc = jnp.dot(xn_ref[...], w_ref[...], preferred_element_type=jnp.float32)
    o_ref[0] = (acc + b_ref[...].astype(jnp.float32)).astype(o_ref.dtype)


def _attn_kernel(q_ref, k_ref, v_ref, o_ref, *, n_heads, scale):
    # grid = (B, q tiles).  K/V blocks carry the full key length and are indexed
    # only by the batch axis, so they stay resident in VMEM across all q tiles of
    # a batch (no re-reads).  All heads are handled with static lane slices; the
    # output is one lane-dense (tq, n_heads*dh) store.  Exact softmax (full keys
    # resident, no padding mask needed) with exact division.
    d_attn = q_ref.shape[-1]
    dh = d_attn // n_heads
    q = q_ref[0].astype(jnp.bfloat16)          # (tq, d_attn)
    k = k_ref[0].astype(jnp.bfloat16)          # (Sk, d_attn)
    v = v_ref[0].astype(jnp.bfloat16)          # (Sk, d_attn)

    outs = []
    for h in range(n_heads):                   # static unrolled loop
        qh = q[:, h * dh:(h + 1) * dh]
        kh = k[:, h * dh:(h + 1) * dh]
        vh = v[:, h * dh:(h + 1) * dh]
        s = lax.dot_general(qh, kh, (((1,), (1,)), ((), ())),
                            preferred_element_type=jnp.float32) * scale   # (tq, Sk)
        m = jnp.max(s, axis=-1, keepdims=True)
        p = jnp.exp(s - m)
        l = jnp.sum(p, axis=-1, keepdims=True)
        oh = jnp.dot(p.astype(jnp.bfloat16), vh,
                     preferred_element_type=jnp.float32)                  # (tq, dh)
        outs.append(oh / l)
    o_ref[0] = jnp.concatenate(outs, axis=-1).astype(o_ref.dtype)


# ----------------------------------------------------------------------------
# pallas_call wrappers
# ----------------------------------------------------------------------------

def linear(x, w, b=None, residual=None, *, tm_cap=512, tn_cap=512, tk_cap=512):
    """x: (M, K) f32, w: (K, N) bf16, b: (N,)|None, residual: (M, N)|None -> (M, N)."""
    M, K = x.shape
    N = w.shape[1]
    dtype = x.dtype
    if b is None:
        b = jnp.zeros((N,), jnp.float32)

    tm, Mp = _pick_tile(M, tm_cap, 8)
    tn, Np = _pick_tile(N, tn_cap, 128)
    tk, Kp = _pick_tile(K, tk_cap, 128)

    xp = _pad2(x, Mp, Kp)
    wp = _pad2(w, Kp, Np)
    bp = _pad2(b.reshape(1, N), 1, Np)

    in_specs = [pl.BlockSpec((tm, tk), lambda i, j, k: (i, k)),
                pl.BlockSpec((tk, tn), lambda i, j, k: (k, j)),
                pl.BlockSpec((1, tn), lambda i, j, k: (0, j))]
    args = [xp, wp, bp]
    if residual is not None:
        in_specs.append(pl.BlockSpec((tm, tn), lambda i, j, k: (i, j)))
        args.append(_pad2(residual, Mp, Np))
        kernel = _matmul_residual_kernel
    else:
        kernel = _matmul_kernel

    out = pl.pallas_call(
        kernel,
        out_shape=jax.ShapeDtypeStruct((Mp, Np), dtype),
        grid=(Mp // tm, Np // tn, Kp // tk),
        in_specs=in_specs,
        out_specs=pl.BlockSpec((tm, tn), lambda i, j, k: (i, j)),
        scratch_shapes=[pltpu.VMEM((tm, tn), jnp.float32)],
        compiler_params=_cparams("parallel", "parallel", "arbitrary"),
    )(*args)
    if (Mp, Np) != (M, N):
        out = out[:M, :N]
    return out


def ln_matmul(x, ln_g, ln_b, w, b=None, *, eps=1e-5, tm_cap=512, tn_cap=512):
    """Fused LayerNorm (over K) followed by xn @ w + b.  w is bf16."""
    M, K = x.shape
    N = w.shape[1]
    if b is None:
        b = jnp.zeros((N,), jnp.float32)

    tm, Mp = _pick_tile(M, tm_cap, 8)
    tn, Np = _pick_tile(N, tn_cap, 128)
    xp = _pad2(x, Mp, K)
    wp = _pad2(w, K, Np)
    bp = _pad2(b.reshape(1, N), 1, Np)

    out = pl.pallas_call(
        functools.partial(_ln_matmul_kernel, eps=eps),
        out_shape=jax.ShapeDtypeStruct((Mp, Np), x.dtype),
        grid=(Mp // tm, Np // tn),
        in_specs=[pl.BlockSpec((tm, K), lambda i, j: (i, 0)),
                  pl.BlockSpec((1, K), lambda i, j: (0, 0)),
                  pl.BlockSpec((1, K), lambda i, j: (0, 0)),
                  pl.BlockSpec((K, tn), lambda i, j: (0, j)),
                  pl.BlockSpec((1, tn), lambda i, j: (0, j))],
        out_specs=pl.BlockSpec((tm, tn), lambda i, j: (i, j)),
        scratch_shapes=[pltpu.VMEM((tm, K), jnp.bfloat16)],
        compiler_params=_cparams("parallel", "arbitrary"),
    )(xp, ln_g.reshape(1, K), ln_b.reshape(1, K), wp, bp)
    if (Mp, Np) != (M, N):
        out = out[:M, :N]
    return out


def ln_geglu(x, ln_g, ln_b, wa, ba, wg, bg, *, eps=1e-5, tm_cap=512, tn_cap=512):
    """Fused LayerNorm + GeGLU: (xn@Wa + ba) * gelu(xn@Wg + bg).  Wa/Wg are bf16."""
    M, K = x.shape
    N = wa.shape[1]

    tm, Mp = _pick_tile(M, tm_cap, 8)
    tn, Np = _pick_tile(N, tn_cap, 128)
    xp = _pad2(x, Mp, K)
    wap, wgp = _pad2(wa, K, Np), _pad2(wg, K, Np)
    bap, bgp = _pad2(ba.reshape(1, N), 1, Np), _pad2(bg.reshape(1, N), 1, Np)

    out = pl.pallas_call(
        functools.partial(_ln_geglu_kernel, eps=eps),
        out_shape=jax.ShapeDtypeStruct((Mp, Np), x.dtype),
        grid=(Mp // tm, Np // tn),
        in_specs=[pl.BlockSpec((tm, K), lambda i, j: (i, 0)),
                  pl.BlockSpec((1, K), lambda i, j: (0, 0)),
                  pl.BlockSpec((1, K), lambda i, j: (0, 0)),
                  pl.BlockSpec((K, tn), lambda i, j: (0, j)),
                  pl.BlockSpec((1, tn), lambda i, j: (0, j)),
                  pl.BlockSpec((K, tn), lambda i, j: (0, j)),
                  pl.BlockSpec((1, tn), lambda i, j: (0, j))],
        out_specs=pl.BlockSpec((tm, tn), lambda i, j: (i, j)),
        scratch_shapes=[pltpu.VMEM((tm, K), jnp.bfloat16)],
        compiler_params=_cparams("parallel", "arbitrary"),
    )(xp, ln_g.reshape(1, K), ln_b.reshape(1, K), wap, bap, wgp, bgp)
    if (Mp, Np) != (M, N):
        out = out[:M, :N]
    return out


def gn_proj_in(xt, scale, shift, w, b, *, tm_cap=512, tn_cap=512):
    """Fused GroupNorm-affine apply + proj_in matmul.

    xt: (B, HW, C) f32 token-layout activations, scale/shift: (B, 1, C) f32
    per-(batch, channel) GroupNorm scale/shift, w: (C, N) bf16, b: (N,).
    """
    B, M, K = xt.shape
    N = w.shape[1]

    tm, Mp = _pick_tile(M, tm_cap, 8)
    tn, Np = _pick_tile(N, tn_cap, 128)
    xp = xt if Mp == M else jnp.pad(xt, ((0, 0), (0, Mp - M), (0, 0)))
    wp = _pad2(w, K, Np)
    bp = _pad2(b.reshape(1, N), 1, Np)

    out = pl.pallas_call(
        _scale_shift_matmul_kernel,
        out_shape=jax.ShapeDtypeStruct((B, Mp, Np), xt.dtype),
        grid=(B, Mp // tm, Np // tn),
        in_specs=[pl.BlockSpec((1, tm, K), lambda b_, i, j: (b_, i, 0)),
                  pl.BlockSpec((1, 1, K), lambda b_, i, j: (b_, 0, 0)),
                  pl.BlockSpec((1, 1, K), lambda b_, i, j: (b_, 0, 0)),
                  pl.BlockSpec((K, tn), lambda b_, i, j: (0, j)),
                  pl.BlockSpec((1, tn), lambda b_, i, j: (0, j))],
        out_specs=pl.BlockSpec((1, tm, tn), lambda b_, i, j: (b_, i, j)),
        scratch_shapes=[pltpu.VMEM((tm, K), jnp.bfloat16)],
        compiler_params=_cparams("parallel", "parallel", "arbitrary"),
    )(xp, scale, shift, wp, bp)
    if (Mp, Np) != (M, N):
        out = out[:, :M, :N]
    return out


def attention(q, k, v, n_heads, scale, *, tq_cap=256):
    """q: (B, Sq, d_attn), k/v: (B, Sk, d_attn) -> (B, Sq, d_attn).

    K/V are fully resident per batch (DMAed once, reused across q tiles); heads
    are handled inside the kernel — no head split/merge transposes in JAX.
    """
    B, Sq, d_attn = q.shape
    Sk = k.shape[1]

    tq, Sqp = _pick_tile(Sq, tq_cap, 8)
    if Sqp != Sq:
        q = jnp.pad(q, ((0, 0), (0, Sqp - Sq), (0, 0)))

    out = pl.pallas_call(
        functools.partial(_attn_kernel, n_heads=n_heads, scale=scale),
        out_shape=jax.ShapeDtypeStruct((B, Sqp, d_attn), q.dtype),
        grid=(B, Sqp // tq),
        in_specs=[pl.BlockSpec((1, tq, d_attn), lambda b, i: (b, i, 0)),
                  pl.BlockSpec((1, Sk, d_attn), lambda b, i: (b, 0, 0)),
                  pl.BlockSpec((1, Sk, d_attn), lambda b, i: (b, 0, 0))],
        out_specs=pl.BlockSpec((1, tq, d_attn), lambda b, i: (b, i, 0)),
        compiler_params=_cparams("parallel", "parallel"),
    )(q, k, v)
    if Sqp != Sq:
        out = out[:, :Sq, :]
    return out


# ----------------------------------------------------------------------------
# Module forward (layout glue in plain JAX, compute in the kernels above)
# ----------------------------------------------------------------------------

def transformer_block(xt, cond, p):
    B, S, dm = xt.shape
    x2 = xt.reshape(B * S, dm)

    # --- self-attention: fused LayerNorm1 + pre-concatenated QKV projection ---
    a1 = p["attn1"]
    d_attn = a1["d_attn"]
    qkv = ln_matmul(x2, p["ln1_g"], p["ln1_b"], a1["w_qkv"])         # (B*S, 3*d_attn)
    q = qkv[:, :d_attn].reshape(B, S, d_attn)
    k = qkv[:, d_attn:2 * d_attn].reshape(B, S, d_attn)
    v = qkv[:, 2 * d_attn:].reshape(B, S, d_attn)
    attn = attention(q, k, v, a1["n_heads"], a1["scale"])
    x2 = linear(attn.reshape(B * S, d_attn), a1["wo"], a1["bo"], residual=x2)

    # --- cross-attention: fused LN2+Q; K|V projections fused into one matmul ---
    a2 = p["attn2"]
    Sc, dc = cond.shape[1], cond.shape[2]
    c2 = cond.reshape(B * Sc, dc)
    q = ln_matmul(x2, p["ln2_g"], p["ln2_b"], a2["wq"]).reshape(B, S, d_attn)
    kv = linear(c2, a2["w_kv"])                                      # (B*Sc, 2*d_attn)
    k = kv[:, :d_attn].reshape(B, Sc, d_attn)
    v = kv[:, d_attn:].reshape(B, Sc, d_attn)
    attn = attention(q, k, v, a2["n_heads"], a2["scale"])
    x2 = linear(attn.reshape(B * S, d_attn), a2["wo"], a2["bo"], residual=x2)

    # --- feed-forward: fused LayerNorm3 + GeGLU, then Linear fused with residual ---
    # (nn.Dropout(0.0) in the reference is an identity and is omitted.)
    ff = p["ff"]
    h = ln_geglu(x2, p["ln3_g"], p["ln3_b"], ff["wa"], ff["ba"], ff["wg"], ff["bg"])
    x2 = linear(h, ff["w2"], ff["b2"], residual=x2)
    return x2.reshape(B, S, dm)


def spatial_transformer(x, cond, params):
    """x: (B, C, H, W) NCHW (same as PyTorch), cond: (B, n_cond, d_cond).

    Expects params from prepare_params(init_params(...)).
    """
    B, C, H, W = x.shape
    G = 32
    assert C % G == 0, "GroupNorm(32) requires channels divisible by 32"
    Cg = C // G
    HW = H * W

    # GroupNorm(32, C, eps=1e-6): tiny per-(batch, group) stats in plain JAX,
    # affine application fused into the proj_in matmul below.
    xg = x.reshape(B, G, Cg * HW).astype(jnp.float32)
    mean = jnp.mean(xg, axis=-1)                                   # (B, G)
    var = jnp.var(xg, axis=-1)                                     # (B, G), biased
    rstd = lax.rsqrt(var + 1e-6)
    gamma = params["gn_g"].reshape(G, Cg)
    beta = params["gn_b"].reshape(G, Cg)
    scale = (rstd[:, :, None] * gamma[None, :, :]).reshape(B, 1, C)
    shift = (beta[None, :, :]
             - mean[:, :, None] * rstd[:, :, None] * gamma[None, :, :]).reshape(B, 1, C)

    # One transpose to token layout; GN apply + proj_in 1x1 conv fused in Pallas.
    xt = x.transpose(0, 2, 3, 1).reshape(B, HW, C)
    h = gn_proj_in(xt, scale, shift, params["proj_in_w"], params["proj_in_b"])

    for blk in params["blocks"]:
        h = transformer_block(h, cond, blk)

    out = linear(h.reshape(B * HW, C), params["proj_out_w"], params["proj_out_b"])
    out = out.reshape(B, H, W, C).transpose(0, 3, 1, 2)
    return out + x                          # outer residual in NCHW (no x_in transpose)


# ----------------------------------------------------------------------------
# Deterministic parameter construction (matches the PyTorch module's shapes).
# Linear/conv weights stored as (in_features, out_features) for x @ W.
# ----------------------------------------------------------------------------

def init_params(key, channels, n_heads, n_layers, d_cond):
    d_model = channels
    d_head = channels // n_heads
    d_attn = n_heads * d_head
    keys = iter(jax.random.split(key, 256))

    def w(shape, scale=0.02):
        return scale * jax.random.normal(next(keys), shape, jnp.float32)

    params = {
        "gn_g": jnp.ones((channels,), jnp.float32),
        "gn_b": jnp.zeros((channels,), jnp.float32),
        "proj_in_w": w((channels, channels)),
        "proj_in_b": w((channels,)),
        "proj_out_w": w((channels, channels)),
        "proj_out_b": w((channels,)),
        "blocks": [],
    }
    for _ in range(n_layers):
        blk = {
            "ln1_g": jnp.ones((d_model,), jnp.float32),
            "ln1_b": jnp.zeros((d_model,), jnp.float32),
            "ln2_g": jnp.ones((d_model,), jnp.float32),
            "ln2_b": jnp.zeros((d_model,), jnp.float32),
            "ln3_g": jnp.ones((d_model,), jnp.float32),
            "ln3_b": jnp.zeros((d_model,), jnp.float32),
            "attn1": {
                "wq": w((d_model, d_attn)), "wk": w((d_model, d_attn)),
                "wv": w((d_model, d_attn)), "wo": w((d_attn, d_model)),
                "bo": w((d_model,)),
                "n_heads": n_heads, "scale": d_head ** (-0.5),
            },
            "attn2": {
                "wq": w((d_model, d_attn)), "wk": w((d_cond, d_attn)),
                "wv": w((d_cond, d_attn)), "wo": w((d_attn, d_model)),
                "bo": w((d_model,)),
                "n_heads": n_heads, "scale": d_head ** (-0.5),
            },
            "ff": {
                "w1": w((d_model, 2 * 4 * d_model)), "b1": w((2 * 4 * d_model,)),
                "w2": w((4 * d_model, d_model)), "b2": w((d_model,)),
            },
        }
        params["blocks"].append(blk)
    return params


def prepare_params(params, weight_dtype=jnp.bfloat16):
    """One-time prep: cast weights to bf16 and pre-concatenate QKV / K|V weights."""
    p = {
        "gn_g": params["gn_g"], "gn_b": params["gn_b"],
        "proj_in_w": params["proj_in_w"].astype(weight_dtype),
        "proj_in_b": params["proj_in_b"],
        "proj_out_w": params["proj_out_w"].astype(weight_dtype),
        "proj_out_b": params["proj_out_b"],
        "blocks": [],
    }
    for blk in params["blocks"]:
        a1, a2, ff = blk["attn1"], blk["attn2"], blk["ff"]
        d_attn = a1["wq"].shape[1]
        d_ff = ff["w2"].shape[0]
        nb = {
            "ln1_g": blk["ln1_g"], "ln1_b": blk["ln1_b"],
            "ln2_g": blk["ln2_g"], "ln2_b": blk["ln2_b"],
            "ln3_g": blk["ln3_g"], "ln3_b": blk["ln3_b"],
            "attn1": {
                "w_qkv": jnp.concatenate([a1["wq"], a1["wk"], a1["wv"]],
                                         axis=1).astype(weight_dtype),
                "wo": a1["wo"].astype(weight_dtype), "bo": a1["bo"],
                "n_heads": a1["n_heads"], "scale": a1["scale"], "d_attn": d_attn,
            },
            "attn2": {
                "wq": a2["wq"].astype(weight_dtype),
                "w_kv": jnp.concatenate([a2["wk"], a2["wv"]],
                                        axis=1).astype(weight_dtype),
                "wo": a2["wo"].astype(weight_dtype), "bo": a2["bo"],
                "n_heads": a2["n_heads"], "scale": a2["scale"], "d_attn": d_attn,
            },
            "ff": {
                "wa": ff["w1"][:, :d_ff].astype(weight_dtype), "ba": ff["b1"][:d_ff],
                "wg": ff["w1"][:, d_ff:].astype(weight_dtype), "bg": ff["b1"][d_ff:],
                "w2": ff["w2"].astype(weight_dtype), "b2": ff["b2"],
            },
        }
        p["blocks"].append(nb)
    return p


if __name__ == "__main__":
    # channels must be divisible by 32 (GroupNorm num_groups=32)
    B, C, H, W = 2, 64, 8, 8
    n_heads, n_layers, d_cond, n_cond = 2, 1, 32, 8

    key = jax.random.PRNGKey(0)
    k_x, k_c, k_p = jax.random.split(key, 3)
    x = jax.random.normal(k_x, (B, C, H, W), jnp.float32)
    cond = jax.random.normal(k_c, (B, n_cond, d_cond), jnp.float32)
    params = prepare_params(init_params(k_p, C, n_heads, n_layers, d_cond))

    out = spatial_transformer(x, cond, params)
    out = jax.block_until_ready(out)
    assert out.shape == (B, C, H, W)
    assert bool(jnp.all(jnp.isfinite(out)))
    print("KERNEL_OK")
</pallas_src>

<mosaic_0001>
module attributes {stable_mosaic.version = 11 : i64} {
  func.func @_scale_shift_matmul_kernel(%arg0: i32, %arg1: i32, %arg2: i32, %arg3: memref<1x64x64xf32, #tpu.memory_space<vmem>>, %arg4: memref<1x1x64xf32, #tpu.memory_space<vmem>>, %arg5: memref<1x1x64xf32, #tpu.memory_space<vmem>>, %arg6: memref<64x64xbf16, #tpu.memory_space<vmem>>, %arg7: memref<1x64xf32, #tpu.memory_space<vmem>>, %arg8: memref<1x64x64xf32, #tpu.memory_space<vmem>>, %arg9: memref<64x64xbf16, #tpu.memory_space<vmem>>) attributes {dimension_semantics = [#tpu.dimension_semantics<parallel>, #tpu.dimension_semantics<parallel>, #tpu.dimension_semantics<arbitrary>], iteration_bounds = array<i64: 2, 1, 1>, scalar_prefetch = 0 : i64, scratch_operands = 1 : i64, tpu.core_type = #tpu.core_type<tc>, window_params = [{transform_indices = @transform_0, window_bounds = array<i64: 1, 64, 64>}, {transform_indices = @transform_1, window_bounds = array<i64: 1, 1, 64>}, {transform_indices = @transform_2, window_bounds = array<i64: 1, 1, 64>}, {transform_indices = @transform_3, window_bounds = array<i64: 64, 64>}, {transform_indices = @transform_4, window_bounds = array<i64: 1, 64>}, {transform_indices = @transform_5, window_bounds = array<i64: 1, 64, 64>}]} {
    %c0_i32 = arith.constant 0 : i32
    %0 = arith.cmpi eq, %arg2, %c0_i32 : i32
    %1 = arith.extui %0 : i1 to i32
    %c0_i32_0 = arith.constant 0 : i32
    %2 = arith.cmpi ne, %1, %c0_i32_0 : i32
    scf.if %2 {
      %c0_9 = arith.constant 0 : index
      %c0_10 = arith.constant 0 : index
      %c0_11 = arith.constant 0 : index
      %12 = vector.load %arg3[%c0_9, %c0_10, %c0_11] : memref<1x64x64xf32, #tpu.memory_space<vmem>>, vector<1x64x64xf32>
      %13 = vector.shape_cast %12 : vector<1x64x64xf32> to vector<64x64xf32>
      %c0_12 = arith.constant 0 : index
      %c0_13 = arith.constant 0 : index
      %c0_14 = arith.constant 0 : index
      %14 = vector.load %arg4[%c0_12, %c0_13, %c0_14] : memref<1x1x64xf32, #tpu.memory_space<vmem>>, vector<1x1x64xf32>
      %15 = vector.shape_cast %14 : vector<1x1x64xf32> to vector<1x64xf32>
      %16 = vector.broadcast %15 : vector<1x64xf32> to vector<64x64xf32>
      %17 = arith.mulf %13, %16 : vector<64x64xf32>
      %c0_15 = arith.constant 0 : index
      %c0_16 = arith.constant 0 : index
      %c0_17 = arith.constant 0 : index
      %18 = vector.load %arg5[%c0_15, %c0_16, %c0_17] : memref<1x1x64xf32, #tpu.memory_space<vmem>>, vector<1x1x64xf32>
      %19 = vector.shape_cast %18 : vector<1x1x64xf32> to vector<1x64xf32>
      %20 = vector.broadcast %19 : vector<1x64xf32> to vector<64x64xf32>
      %21 = arith.addf %17, %20 : vector<64x64xf32>
      %22 = arith.truncf %21 : vector<64x64xf32> to vector<64x64xbf16>
      %c0_18 = arith.constant 0 : index
      %c0_19 = arith.constant 0 : index
      %23 = vector.load %arg9[%c0_18, %c0_19] : memref<64x64xbf16, #tpu.memory_space<vmem>>, vector<64x64xbf16>
      tpu.vector_store %arg9[%c0_18, %c0_19], %22 {strides = array<i32>} : memref<64x64xbf16, #tpu.memory_space<vmem>>, vector<64x64xbf16>,
    } else {
    }
    %c0 = arith.constant 0 : index
    %c0_1 = arith.constant 0 : index
    %3 = vector.load %arg9[%c0, %c0_1] : memref<64x64xbf16, #tpu.memory_space<vmem>>, vector<64x64xbf16>
    %c0_2 = arith.constant 0 : index
    %c0_3 = arith.constant 0 : index
    %4 = vector.load %arg6[%c0_2, %c0_3] : memref<64x64xbf16, #tpu.memory_space<vmem>>, vector<64x64xbf16>
    %cst = arith.constant dense<0.000000e+00> : vector<64x64xf32>
    %5 = tpu.matmul %3, %4, %cst {dimension_numbers = #tpu.dot_dimension_numbers<[1], [0], [0], [1], [0, 0, 1, 1], [], []>} : vector<64x64xbf16>, vector<64x64xbf16>, vector<64x64xf32> -> vector<64x64xf32>
    %c0_4 = arith.constant 0 : index
    %c0_5 = arith.constant 0 : index
    %6 = vector.load %arg7[%c0_4, %c0_5] : memref<1x64xf32, #tpu.memory_space<vmem>>, vector<1x64xf32>
    %7 = vector.broadcast %6 : vector<1x64xf32> to vector<64x64xf32>
    %8 = arith.addf %5, %7 : vector<64x64xf32>
    %c0_6 = arith.constant 0 : index
    %c0_7 = arith.constant 0 : index
    %c0_8 = arith.constant 0 : index
    %9 = vector.load %arg8[%c0_6, %c0_7, %c0_8] : memref<1x64x64xf32, #tpu.memory_space<vmem>>, vector<1x64x64xf32>
    %10 = vector.shape_cast %9 : vector<1x64x64xf32> to vector<64x64xf32>
    %11 = vector.shape_cast %8 : vector<64x64xf32> to vector<1x64x64xf32>
    tpu.vector_store %arg8[%c0_6, %c0_7, %c0_8], %11 {strides = array<i32>} : memref<1x64x64xf32, #tpu.memory_space<vmem>>, vector<1x64x64xf32>,
    return
  }
  func.func @transform_0(%arg0: i32, %arg1: i32, %arg2: i32) -> (i32, i32, i32) {
    %c0_i32 = arith.constant 0 : i32
    %c0_i32_0 = arith.constant 0 : i32
    return %arg0, %arg1, %c0_i32 : i32, i32, i32
  }
  func.func @transform_1(%arg0: i32, %arg1: i32, %arg2: i32) -> (i32, i32, i32) {
    %c0_i32 = arith.constant 0 : i32
    %c0_i32_0 = arith.constant 0 : i32
    %c0_i32_1 = arith.constant 0 : i32
    return %arg0, %c0_i32, %c0_i32_0 : i32, i32, i32
  }
  func.func @transform_2(%arg0: i32, %arg1: i32, %arg2: i32) -> (i32, i32, i32) {
    %c0_i32 = arith.constant 0 : i32
    %c0_i32_0 = arith.constant 0 : i32
    %c0_i32_1 = arith.constant 0 : i32
    return %arg0, %c0_i32, %c0_i32_0 : i32, i32, i32
  }
  func.func @transform_3(%arg0: i32, %arg1: i32, %arg2: i32) -> (i32, i32) {
    %c0_i32 = arith.constant 0 : i32
    %c0_i32_0 = arith.constant 0 : i32
    return %c0_i32, %arg2 : i32, i32
  }
  func.func @transform_4(%arg0: i32, %arg1: i32, %arg2: i32) -> (i32, i32) {
    %c0_i32 = arith.constant 0 : i32
    %c0_i32_0 = arith.constant 0 : i32
    return %c0_i32, %arg2 : i32, i32
  }
  func.func @transform_5(%arg0: i32, %arg1: i32, %arg2: i32) -> (i32, i32, i32) {
    %c0_i32 = arith.constant 0 : i32
    return %arg0, %arg1, %arg2 : i32, i32, i32
  }
}

</mosaic_0001>

<bundles_post_ra>
// kernel: tpu_custom_call.1
= control target key start
LH: loop header
LB: loop body
LE: loop exit
PB: predicated region body
PF: predicated region fallthrough
CT: control target
= control target key end

     0   :  { %10 = vsyncpa [#allocation4], 0  ;;  %s1258_s0 = inlined_call_operand.hbm [shape: f32[2,64,64], index: 0, kind: input, shape index: {}]   ;;  %s1259_s1 = inlined_call_operand.vmem [shape: f32[2,1,64], index: 1, kind: input, shape index: {}]   ;;  %s1260_s2 = inlined_call_operand.vmem [shape: f32[2,1,64], index: 2, kind: input, shape index: {}]   ;;  %s1261_s3 = inlined_call_operand.hbm [shape: bf16[64,64], index: 3, kind: input, shape index: {}]   ;;  %s1262_s4 = inlined_call_operand.vmem [shape: f32[1,64], index: 4, kind: input, shape index: {}]   ;;  %s1263_s5 = inlined_call_operand.hbm [shape: f32[2,64,64], index: 5, kind: output, shape index: {}]  }
   0x1   :  { %12 = vsyncpa [#allocation4 + $0x1], 0 }
   0x2   :  { %13 = vsyncpa [#allocation7], 0 }
   0x3   :  { %14 = vsyncpa [#allocation5], 0 }
   0x4   :  { %16 = vsyncpa [#allocation5 + $0x1], 0  ;;  %s998_s18 = smov 0   ;;  %s1000_s19 = smov 0  }
   0x5   :  { %s1002_s20 = smov 0   ;;  %s1004_s21 = smov 0  }
   0x6   :  { %s1006_s22 = smov 0   ;;  %s1008_s23 = smov 0  }
   0x7 LB: > { %s667_s24 = sadd.s32 4294967295, %s957_s23   ;;  %s668_s25 = sadd.s32 4294967294, %s957_s23   ;;  %s957_s23 = sphi %s1008_s23, %s22_s23   ;;  %s953_s22 = sphi %s1006_s22, %s1287_s22   ;;  %s949_s21 = sphi %s1004_s21, %s1286_s21   ;;  %s945_s20 = sphi %s1002_s20, %s1285_s20   ;;  %s941_s19 = sphi %s1000_s19, %s1284_s19   ;;  %s937_s18 = sphi %s998_s18, %s1283_s18  }
   0x8   : > { %p63_p0 = scmp.ne.s32.totalorder %s941_s19, %s937_s18  ;;  %p1032_p1 = scmp.eq.s32.totalorder %s667_s24, 0 }
   0x9   : > { %p1036_p2 = scmp.eq.s32.totalorder %s667_s24, 1  ;;  %p201_p3 = scmp.eq.s32.totalorder %s668_s25, 1 }
   0xa   : > { %s1268_s26 = scalar_select %p1032_p1, 1, 0 }
   0xb   : > { %s1269_s27 = scalar_select %p1036_p2, 1, 0 }
   0xc   : > { %p1042_p4 = por %p1032_p1, %p63_p0  ;;  %p669_p5 = scmp.ge.s32.totalorder %s957_s23, 1 }
   0xd   : > { %p1047_p6 = por %p201_p3, %p63_p0  ;;  %p208_p7 = scmp.lt.s32.totalorder %s957_s23, 3 }
   0xe   : > { %s1270_s28 = scalar_select %p1042_p4, 1, 0 }
   0xf   : > { %s1271_s29 = scalar_select %p1047_p6, 1, 0 }
  0x10   : > { %p1052_p8 = pnand %p669_p5, %p208_p7  ;;  %s959_s6 = smov [#allocation6]  }
  0x11   : > { %s222_s7 = sshll.u32 %s959_s6, 4  ;;  %s41_s9 = sadd.s32 1, %s953_s22  ;;  %s223_s7 = int_to_ptr.vmem [resolvable:$true] %s222_s7 }
  0x12   : > { %s1272_s30 = scalar_select %p1052_p8, 1, 0 }
  0x13   : > { %p738_p9 = pneg %p1052_p8  ;;  %s813_s12 = scalar_lea.hbm %s1261_s3, 512 }
  0x14   : > { %p814_p12 = scmp.ne.s32.totalorder %s1261_s3, %s813_s12  ;;  %p820_p5 = scmp.lt.u32.totalorder %s813_s12, %s1261_s3 }
  0x15   : > { %p1061_p11 = pnand %p738_p9, %p1032_p1 }
  0x17   : > { %p815_p13 = pneg %p1061_p11 }
  0x19   : > { %p816_p0 = pnand %p815_p13, %p814_p12 }
  0x1b   : > { %p817_p3 = pneg %p816_p0 }
  0x1d   : > { %p822_p7 = pnand %p820_p5, %p817_p3 }
  0x1f   : > { %825 = shalt.err (!%p822_p7)
}
  0x20   : > { %s826_s17 = scalar_lea.vmem %s223_s7, 512  ;;  %p834_p1 = scmp.lt.s32.totalorder %s223_s7, %s223_s7 }
  0x21   : > { %p827_p9 = scmp.ne.s32.totalorder %s223_s7, %s826_s17  ;;  %p835_p4 = scmp.lt.s32.totalorder %s826_s17, %s826_s17 }
  0x23   : > { %p829_p10 = pnand %p827_p9, %p815_p13  ;;  %p836_p8 = por %p835_p4, %p834_p1 }
  0x25   : > { %p830_p6 = pneg %p829_p10 }
  0x27   : > { %p837_p2 = pnand %p836_p8, %p830_p6 }
  0x29   : > { %840 = shalt.err (!%p837_p2)
}
  0x2a   : > { %s960_s24 = smov 64   ;;  %s961_s25 = smov 4  }
  0x2b   : > { %741 = dma.hbm_to_vmem [thread:$0]  (!%p1061_p11), %s1261_s3, 512, %s223_s7, [#allocation7], %s960_s24, %s960_s24, %s961_s25  }
  0x2c   : > { %p43_p1 = scmp.ge.s32.totalorder %s41_s9, 2  ;;  %s50_s11 = sadd.s32 1, %s945_s20 }
  0x2d   : > { %p57_p2 = scmp.ne.s32.totalorder %s945_s20, %s941_s19  ;;  %p58_p4 = scmp.eq.s32.totalorder %s957_s23, 0 }
  0x2e   : > { %s1289_s9 = smov (%p43_p1, %s41_s9), 0  ;;  %p1275_p8 = scmp.ne.s32.totalorder %s1269_s27, 0 }
  0x2f   : > { %p1088_p6 = por %p58_p4, %p57_p2  ;;  %s45_s8 = ssub.s32 %s953_s22, %s1289_s9 }
  0x30   : > { %p1094_p10 = por %p1275_p8, %p57_p2  ;;  %p751_p12 = scmp.lt.s32.totalorder %s957_s23, 2 }
  0x31   : > { %p48_p11 = scmp.eq.s32.totalorder %s45_s8, 0  ;;  %s242_s7 = sand.u32 1, %s945_s20  }
  0x32   : > { %s673_s14 = sshll.u32 %s242_s7, 6  ;;  %s696_s16 = sshll.u32 %s953_s22, 10 }
  0x33   : > { %s1103_s15 = scalar_select %p48_p11, %s945_s20, %s50_s11  }
  0x34   : > { %s1109_s25 = scalar_lea.hbm %s1258_s0, %s696_s16  ;;  %s246_s27 = scalar_lea.vmem [#allocation3], %s673_s14 }
  0x35   : > { %s255_s6 = sshll.u32 %s246_s27, 4  ;;  %p1115_p13 = pnand %p751_p12, %p1088_p6  ;;  %s1111_s6 = int_to_ptr.vmem [resolvable:$true] %s255_s6 }
  0x36   : > { %s1119_s11 = scalar_lea.sflag [#allocation4], %s242_s7  ;;  %s841_s8 = scalar_lea.hbm %s1109_s25, 1024 }
  0x37   : > { %p842_p0 = scmp.ne.s32.totalorder %s1109_s25, %s841_s8  ;;  %p843_p3 = pneg %p1115_p13 }
  0x38   : > { %s846_s12 = scalar_lea.hbm %s1258_s0, 2048  ;;  %p847_p9 = scmp.lt.u32.totalorder %s1109_s25, %s1258_s0 }
  0x39   : > { %p844_p5 = pnand %p843_p3, %p842_p0  ;;  %p848_p1 = scmp.lt.u32.totalorder %s846_s12, %s841_s8 }
  0x3a   : > { %p850_p4 = scmp.lt.u32.totalorder %s841_s8, %s1109_s25 }
  0x3b   : > { %p845_p7 = pneg %p844_p5  ;;  %p849_p2 = por %p848_p1, %p847_p9 }
  0x3d   : > { %p851_p6 = por %p850_p4, %p849_p2 }
  0x3f   : > { %p852_p8 = pnand %p851_p6, %p845_p7 }
  0x41   : > { %855 = shalt.err (!%p852_p8)
}
  0x42   : > { %s856_s7 = scalar_lea.vmem %s1111_s6, 1024  ;;  %s962_s27 = smov [#allocation3]  }
  0x43   : > { %p857_p12 = scmp.ne.s32.totalorder %s1111_s6, %s856_s7  ;;  %s861_s14 = sshll.u32 %s962_s27, 4  ;;  %s862_s14 = int_to_ptr.vmem [resolvable:$false] %s861_s14 }
  0x44   : > { %s863_s16 = scalar_lea.vmem %s862_s14, 2048  ;;  %p864_p5 = scmp.lt.s32.totalorder %s1111_s6, %s862_s14 }
  0x45   : > { %p859_p11 = pnand %p857_p12, %p843_p3  ;;  %p865_p9 = scmp.lt.s32.totalorder %s863_s16, %s856_s7 }
  0x47   : > { %p860_p0 = pneg %p859_p11  ;;  %p866_p1 = por %p865_p9, %p864_p5 }
  0x49   : > { %p867_p2 = pnand %p866_p1, %p860_p0 }
  0x4b   : > { %870 = shalt.err (!%p867_p2)
}
  0x4c   : > { %s963_s8 = smov 128   ;;  %s964_s12 = smov 8  }
  0x4d   : > { %745 = dma.hbm_to_vmem [thread:$0]  (!%p1115_p13), %s1109_s25, 1024, %s1111_s6, %s1119_s11, %s963_s8, %s963_s8, %s964_s12  }
  0x4e   : > { %p1278_p3 = scmp.ne.s32.totalorder %s1272_s30, 0 }
  0x4f   : > { %s1150_s17 = sand.u32 (!%p1278_p3), 1, %s941_s19   ;;  %p1279_p7 = scmp.ne.s32.totalorder (!%p1278_p3), %s1270_s28, 0 }
  0x50   : > { %279 = sbr.rel (%p1278_p3) target bundleno = 346 (0x15a), region = 40  ;;  %s677_s24 = sshll.u32 (!%p1278_p3), %s1150_s17, 6 }
  0x51   : > { %s282_s7 = scalar_lea.sflag (!%p1278_p3), [#allocation4], %s1150_s17  ;;  %s1156_s27 = scalar_lea.vmem (!%p1278_p3), [#allocation3], %s677_s24 }
  0x57   : > { %924 = dma.done.wait (%p1279_p7), %s282_s7, 1024  }
  0x58   : > { %926 = vsyncadd (%p1279_p7), %s282_s7, 4294966272  ;;  %p1280_p13 = scmp.ne.s32.totalorder %s1268_s26, 0 }
  0x5a   : > { %928 = dma.done.wait (%p1280_p13), [#allocation7], 512  }
  0x5b   : > { %930 = vsyncadd (%p1280_p13), [#allocation7], 4294966784  ;;  %p326_p4 = scmp.lt.s32.totalorder %s949_s21, 1  ;;  %v809_v0 = vld [vmem:[#allocation6] sm:$0xff]   ;;  %v810_v1 = vld [vmem:[#allocation6 + $0x8] sm:$0xff]   ;;  %vm383_vm0 = vcmask 523264  }
  0x5c   : > { %706 = vmatprep.subr.bf16.mxu0 %v809_v0  ;;  %722 = vmatprep.subr.bf16.mxu1 %v809_v0  ;;  %v811_v2 = vld [vmem:[#allocation6 + $0x10] sm:$0xff]   ;;  %v341_v3 = vld [vmem:[%s1156_s27] sm:$0xff]  ;;  %v342_v4 = vld [vmem:[%s1156_s27 + $0x8] sm:$0xff]  ;;  %s697_s8 = sshll.u32 %s949_s21, 10  ;;  %s324_s12 = scalar_lea.vmem [#allocation8], %s677_s24 }
  0x5d   : > { %s327_s30 = scalar_select %p326_p4, %s949_s21, 1  ;;  %707 = vmatpush3.bf16.msra.mxu0 %v809_v0  ;;  %726 = vmatpush3.bf16.msra.mxu1 %v809_v0  ;;  %v345_v9 = vld [vmem:[%s1156_s27 + $0x20] sm:$0xff]  ;;  %v346_v10 = vld [vmem:[%s1156_s27 + $0x28] sm:$0xff]  ;;  %v343_v13 = vld [vmem:[%s1156_s27 + $0x10] sm:$0xff] }
  0x5e   : > { %708 = vmatprep.subr.bf16.mxu0 %v810_v1  ;;  %723 = vmatprep.subr.bf16.mxu1 %v810_v1  ;;  %v344_v14 = vld [vmem:[%s1156_s27 + $0x18] sm:$0xff]  ;;  %v347_v15 = vld [vmem:[%s1156_s27 + $0x30] sm:$0xff]  ;;  %v682_v38 = vld [vmem:[%s1262_s4] ss:$0 sm:$0xff]  ;;  %s534_s7 = sshll.u32 %s324_s12, 4  ;;  %s965_s6 = smov [#allocation8]   ;;  %s1204_s7 = int_to_ptr.vmem [resolvable:$true] %s534_s7 }
  0x5f   : > { %s328_s28 = scalar_lea.vmem %s1259_s1, %s327_s30  ;;  %s331_s26 = scalar_lea.vmem %s1260_s2, %s327_s30  ;;  %v348_v19 = vld [vmem:[%s1156_s27 + $0x38] sm:$0xff] }
  0x60   : > { %v680_v5 = vld [vmem:[%s328_s28] ss:$0 sm:$0xff]  ;;  %v812_v20 = vld [vmem:[#allocation6 + $0x18] sm:$0xff]   ;;  %s1202_s27 = scalar_lea.hbm %s1263_s5, %s697_s8  ;;  %s518_s30 = scalar_lea.sflag [#allocation5], %s1150_s17 }
  0x61   : > { %v356_v6 = vmul.f32 %v680_v5, %v341_v3  ;;  %v357_v7 = vmul.f32 %v680_v5, %v342_v4  ;;  %v681_v8 = vld [vmem:[%s331_s26] ss:$0 sm:$0xff]  ;;  %v360_v11 = vmul.f32 %v680_v5, %v345_v9  ;;  %v361_v12 = vmul.f32 %v680_v5, %v346_v10  ;;  %709 = vmatpush3.bf16.msra.mxu0 %v810_v1  ;;  %s871_s25 = scalar_lea.vmem %s1204_s7, 1024  ;;  %s875_s28 = sshll.u32 %s965_s6, 4  ;;  %s876_s28 = int_to_ptr.vmem [resolvable:$false] %s875_s28 }
  0x62   : > { %727 = vmatpush3.bf16.msra.mxu1 %v810_v1  ;;  %v358_v18 = vmul.f32 %v680_v5, %v343_v13  ;;  %710 = vmatprep.subr.bf16.mxu0 %v811_v2  ;;  %v359_v23 = vmul.f32 %v680_v5, %v344_v14  ;;  %v362_v26 = vmul.f32 %v680_v5, %v347_v15  ;;  %p872_p6 = scmp.ne.s32.totalorder %s1204_s7, %s871_s25  ;;  %s877_s10 = scalar_lea.vmem %s876_s28, 2048 }
  0x63   : > { %v371_v16 = vadd.f32 %v681_v8, %v356_v6  ;;  %v372_v17 = vadd.f32 %v681_v8, %v357_v7  ;;  %724 = vmatprep.subr.bf16.mxu1 %v811_v2  ;;  %v375_v21 = vadd.f32 %v681_v8, %v360_v11  ;;  %v376_v22 = vadd.f32 %v681_v8, %v361_v12  ;;  %p878_p11 = scmp.lt.s32.totalorder %s1204_s7, %s876_s28  ;;  %p879_p0 = scmp.lt.s32.totalorder %s877_s10, %s871_s25 }
  0x64   : > { %v373_v25 = vadd.f32 %v681_v8, %v358_v18  ;;  %v363_v27 = vmul.f32 %v680_v5, %v348_v19  ;;  %v374_v29 = vadd.f32 %v681_v8, %v359_v23  ;;  %v377_v30 = vadd.f32 %v681_v8, %v362_v26  ;;  %p873_p8 = pnand %p872_p6, %p1094_p10 }
  0x65   : > { %v379_v24 = vpack.c.bf16 %v372_v17, %v371_v16  ;;  %v381_v28 = vpack.c.bf16 %v376_v22, %v375_v21  ;;  %711 = vmatpush3.bf16.msra.mxu0 %v811_v2  ;;  %p880_p5 = por %p879_p0, %p878_p11 }
  0x66   : > { %728 = vmatpush3.bf16.msra.mxu1 %v811_v2  ;;  %v378_v31 = vadd.f32 %v681_v8, %v363_v27  ;;  %712 = vmatprep.subr.bf16.mxu0 %v812_v20  ;;  %v380_v32 = vpack.c.bf16 %v374_v29, %v373_v25  ;;  %p874_p12 = pneg %p873_p8 }
  0x67   : > { %384 = vst.msk [vmem:[#allocation2] sm:$0xff] %vm383_vm0, %v379_v24  ;;  %725 = vmatprep.subr.bf16.mxu1 %v812_v20  ;;  %386 = vst.msk [vmem:[#allocation2 + $0x10] sm:$0xff] %vm383_vm0, %v381_v28 }
  0x68   : > { %v382_v33 = vpack.c.bf16 %v378_v31, %v377_v30  ;;  %385 = vst.msk [vmem:[#allocation2 + $0x8] sm:$0xff] %vm383_vm0, %v380_v32  ;;  %p881_p9 = pnand %p880_p5, %p874_p12 }
  0x69   : > { %713 = vmatpush3.bf16.msra.mxu0 %v812_v20 }
  0x6a   : > { %729 = vmatpush3.bf16.msra.mxu1 %v812_v20  ;;  %387 = vst.msk [vmem:[#allocation2 + $0x18] sm:$0xff] %vm383_vm0, %v382_v33 }
  0x6e   : > { %v388_v34 = vld [vmem:[#allocation2] sm:$0xff]  ;;  %v390_v35 = vld [vmem:[#allocation2 + $0x10] sm:$0xff] }
  0x6f   : > { %714 = vmatprep.mubr.msk.bf16.mxu0 %vm383_vm0, %v388_v34  ;;  %718 = vmatprep.mubr.msk.bf16.mxu1 %vm383_vm0, %v390_v35  ;;  %v389_v36 = vld [vmem:[#allocation2 + $0x8] sm:$0xff] }
  0x70   : > { %715 = vmatmul.mubr.msk.bf16.vlgmr.msra.gmra.mrb[0].mxu0 %vm383_vm0, %v389_v36 }
  0x71   : > { %v391_v37 = vld [vmem:[#allocation2 + $0x18] sm:$0xff] }
  0x72   : > { %719 = vmatmul.mubr.msk.bf16.vlgmr.msra.gmra.mrb[0].mxu1 %vm383_vm0, %v391_v37 }
 0x143   : > { %v716_v39 = vpop.f32.mrb[0].mxu0 }
 0x144   : > { %v487_v40 = vadd.f32 %v716_v39, %v682_v38  ;;  %v478_v42 = vpop.f32.mrb[1].mxu0 }
 0x145   : > { %v720_v41 = vpop.f32.mrb[0].mxu1  ;;  %v479_v44 = vadd.f32 %v682_v38, %v478_v42  ;;  %v717_v46 = vpop.f32.mrb[2].mxu0 }
 0x146   : > { %v503_v43 = vadd.f32 %v720_v41, %v682_v38  ;;  %v494_v45 = vpop.f32.mrb[1].mxu1  ;;  %511 = vst.msk [vmem:[%s324_s12 + $0x10] sm:$0xff] %vm383_vm0, %v487_v40  ;;  %v490_v48 = vadd.f32 %v717_v46, %v682_v38  ;;  %v481_v50 = vpop.f32.mrb[3].mxu0 }
 0x147   : > { %v495_v47 = vadd.f32 %v682_v38, %v494_v45  ;;  %v721_v49 = vpop.f32.mrb[2].mxu1  ;;  %509 = vst.msk [vmem:[%s324_s12] sm:$0xff] %vm383_vm0, %v479_v44  ;;  %v482_v52 = vadd.f32 %v682_v38, %v481_v50 }
 0x148   : > { %515 = vst.msk [vmem:[%s324_s12 + $0x30] sm:$0xff] %vm383_vm0, %v503_v43  ;;  %v506_v51 = vadd.f32 %v721_v49, %v682_v38  ;;  %v497_v53 = vpop.f32.mrb[3].mxu1  ;;  %512 = vst.msk [vmem:[%s324_s12 + $0x18] sm:$0xff] %vm383_vm0, %v490_v48 }
 0x149   : > { %513 = vst.msk [vmem:[%s324_s12 + $0x20] sm:$0xff] %vm383_vm0, %v495_v47  ;;  %v498_v54 = vadd.f32 %v682_v38, %v497_v53  ;;  %510 = vst.msk [vmem:[%s324_s12 + $0x8] sm:$0xff] %vm383_vm0, %v482_v52 }
 0x14a   : > { %516 = vst.msk [vmem:[%s324_s12 + $0x38] sm:$0xff] %vm383_vm0, %v506_v51 }
 0x14b   : > { %514 = vst.msk [vmem:[%s324_s12 + $0x28] sm:$0xff] %vm383_vm0, %v498_v54 }
 0x14c   : > { %884 = shalt.err (!%p881_p9)
}
 0x14d   : > { %s885_s11 = scalar_lea.hbm %s1202_s27, 1024  ;;  %s889_s16 = scalar_lea.hbm %s1263_s5, 2048 }
 0x14e   : > { %p886_p1 = scmp.ne.s32.totalorder %s1202_s27, %s885_s11  ;;  %p890_p7 = scmp.lt.u32.totalorder %s1202_s27, %s1263_s5 }
 0x14f   : > { %p891_p13 = scmp.lt.u32.totalorder %s889_s16, %s885_s11  ;;  %p893_p6 = scmp.lt.u32.totalorder %s885_s11, %s1202_s27 }
 0x150   : > { %p887_p2 = pnand %p886_p1, %p1094_p10 }
 0x151   : > { %p892_p4 = por %p891_p13, %p890_p7 }
 0x152   : > { %p888_p3 = pneg %p887_p2 }
 0x153   : > { %p894_p8 = por %p893_p6, %p892_p4 }
 0x155   : > { %p895_p12 = pnand %p894_p8, %p888_p3 }
 0x157   : > { %898 = shalt.err (!%p895_p12)
}
 0x158   : > { %s966_s21 = smov 128   ;;  %s967_s24 = smov 8  }
 0x159   : > { %736 = dma.vmem_to_hbm [thread:$0]  (%p1094_p10), %s1204_s7, 1024, %s1202_s27, %s518_s30, %s966_s21, %s966_s21, %s967_s24  }
 0x15a PF: > { %s549_s25 = sand.u32 1, %s937_s18   ;;  %p1281_p11 = scmp.ne.s32.totalorder %s1271_s29, 0 }
 0x15b   : > { %p1282_p0 = scmp.ge.s32.totalorder %s957_s23, 2  ;;  %s550_s6 = scalar_lea.sflag [#allocation5], %s549_s25 }
 0x15d   : > { %p747_p5 = pnand %p1282_p0, %p1281_p11 }
 0x15f   : > { %932 = dma.done.wait (!%p747_p5), %s550_s6, 1024  }
 0x160   : > { %934 = vsyncadd (!%p747_p5), %s550_s6, 4294966272  ;;  %s22_s23 = sadd.s32 1, %s957_s23   ;;  %s1283_s18 = smov %s941_s19 }
 0x161   : > { %p19_p9 = scmp.ge.s32.totalorder %s22_s23, 4   ;;  %s1284_s19 = smov %s945_s20 }
 0x162   : > { %s1285_s20 = smov %s1103_s15  ;;  %s1286_s21 = smov %s953_s22 }
 0x163   : > { %s1287_s22 = smov %s1289_s9  ;;  %21 = sbr.rel (!%p19_p9) target bundleno = 7 (0x7), region = 103 }
 0x16a   :  { %555 = vsyncpa [#allocation4], 1 }
 0x16b   :  { %557 = vsyncpa [#allocation4 + $0x1], 1 }
 0x16c   :  { %558 = vsyncpa [#allocation7], 1 }
 0x16d   :  { %559 = vsyncpa [#allocation5], 1 }
 0x16e   :  { %561 = vsyncpa [#allocation5 + $0x1], 1 }

</bundles_post_ra>
